<compile_context>
chip_gen: v7x
topology: tpu7x:2x2x1
jax: 0.10.0
libtpu: 0.0.40
codegen_flags: <defaults>
</compile_context>

<pallas_src>
import jax
import jax.numpy as jnp
from jax.experimental import pallas as pl
from jax.experimental.pallas import tpu as pltpu


def _round_up(x, m):
    return ((x + m - 1) // m) * m


def vqa_head_kernel(img_raw_ref, qst_state_ref,
                    w_img_ref, b_img_ref,
                    w_qst_ref, b_qst_ref,
                    w1_ref, b1_ref,
                    w2_ref, b2_ref,
                    out_ref):
    f32 = jnp.float32
    bf16 = jnp.bfloat16

    # ---- ImgEncoder: fc (bf16 MXU, f32 accumulate) + L2 normalization -----
    img = jnp.dot(img_raw_ref[...], w_img_ref[...],
                  preferred_element_type=f32) + b_img_ref[...]           # (TB, Ep)
    sq = jnp.sum(img * img, axis=-1, keepdims=True)
    img = img * jax.lax.rsqrt(jnp.maximum(sq, 1e-12))                    # EUP rsqrt

    # ---- QstEncoder tail: tanh (f32, EUP) + fc (bf16 MXU) ------------------
    qst = jnp.tanh(qst_state_ref[...]).astype(bf16)
    qst = jnp.dot(qst, w_qst_ref[...],
                  preferred_element_type=f32) + b_qst_ref[...]           # (TB, Ep)

    # ---- VqaModel head: mul -> tanh -> (drop) -> fc1 -> tanh -> (drop) -> fc2
    c = jnp.tanh(img * qst).astype(bf16)
    c = jnp.dot(c, w1_ref[...], preferred_element_type=f32) + b1_ref[...]    # (TB, Ap)
    c = jnp.tanh(c).astype(bf16)
    c = jnp.dot(c, w2_ref[...], preferred_element_type=f32) + b2_ref[...]    # (TB, Ap)
    out_ref[...] = c.astype(out_ref.dtype)


def vqa_forward(img_feat_raw, qst_state, params, *, block_b=None):
    """Fused VqaModel forward.

    img_feat_raw : (B, F)  output of the (truncated) VGG19 classifier
    qst_state    : (B, Q)  concatenated LSTM (hidden, cell) state,
                           Q = 2 * num_layers * hidden_size
    returns      : (B, ans_vocab_size) float32
    """
    B, F = img_feat_raw.shape
    Q = qst_state.shape[1]
    E = params["w_img"].shape[0]          # embed_size
    A = params["w1"].shape[0]             # ans_vocab_size
    bf16 = jnp.bfloat16
    f32 = jnp.float32

    # Pad feature dims to lane multiples so stores are unmasked and MXU
    # N-passes are full.  (F/Q are contraction dims and stay full-block.)
    Ep = _round_up(E, 128)
    Ap = _round_up(A, 128)

    # block_b: multiple of 16 (bf16 sublane packing), capped at 256.
    if block_b is None:
        block_b = min(256, _round_up(max(B, 16), 16))
    block_b = max(16, _round_up(block_b, 16))

    n_tiles = pl.cdiv(B, block_b)
    Bp = n_tiles * block_b

    # ---- wrapper-side layout plumbing (no compute hoisted) ------------------
    img_in = img_feat_raw.astype(bf16)          # bf16 input halves HBM traffic
    qst_in = qst_state.astype(f32)              # tanh'd in f32 inside kernel
    if Bp != B:
        pad = ((0, Bp - B), (0, 0))
        img_in = jnp.pad(img_in, pad)
        qst_in = jnp.pad(qst_in, pad)

    def pad2(x, rows, cols):
        return jnp.pad(x, ((0, rows - x.shape[0]), (0, cols - x.shape[1])))

    w_img_t = pad2(params["w_img"].T.astype(bf16), F, Ep)     # (F, Ep)
    w_qst_t = pad2(params["w_qst"].T.astype(bf16), Q, Ep)     # (Q, Ep)
    w1_t = pad2(params["w1"].T.astype(bf16), Ep, Ap)          # (Ep, Ap)
    w2_t = pad2(params["w2"].T.astype(bf16), Ap, Ap)          # (Ap, Ap)
    b_img = jnp.pad(params["b_img"].astype(f32), (0, Ep - E)).reshape(1, Ep)
    b_qst = jnp.pad(params["b_qst"].astype(f32), (0, Ep - E)).reshape(1, Ep)
    b1 = jnp.pad(params["b1"].astype(f32), (0, Ap - A)).reshape(1, Ap)
    b2 = jnp.pad(params["b2"].astype(f32), (0, Ap - A)).reshape(1, Ap)

    # Explicit scoped-VMEM limit from the real footprint:
    #   weights/biases single-buffered + double-buffered activation/out tiles.
    weight_bytes = 2 * (F * Ep + Q * Ep + Ep * Ap + Ap * Ap) + 4 * (2 * Ep + 2 * Ap)
    act_bytes = 2 * block_b * (2 * F + 4 * Q + 4 * Ap)
    needed = int(1.25 * (weight_bytes + act_bytes)) + (4 << 20)
    vmem_limit = int(min(max(needed, 32 << 20), 60 << 20))   # stay under v7x 64 MiB

    const = lambda b: (0, 0)   # weights / biases: same block every grid step
    single = pl.Buffered(1)    # revisited blocks -> no second buffer

    out = pl.pallas_call(
        vqa_head_kernel,
        out_shape=jax.ShapeDtypeStruct((Bp, Ap), f32),
        grid=(n_tiles,),
        in_specs=[
            pl.BlockSpec((block_b, F), lambda b: (b, 0)),                # img tile
            pl.BlockSpec((block_b, Q), lambda b: (b, 0)),                # qst tile
            pl.BlockSpec((F, Ep), const, pipeline_mode=single),          # W_img^T
            pl.BlockSpec((1, Ep), const, pipeline_mode=single),          # b_img
            pl.BlockSpec((Q, Ep), const, pipeline_mode=single),          # W_qst^T
            pl.BlockSpec((1, Ep), const, pipeline_mode=single),          # b_qst
            pl.BlockSpec((Ep, Ap), const, pipeline_mode=single),         # W1^T
            pl.BlockSpec((1, Ap), const, pipeline_mode=single),          # b1
            pl.BlockSpec((Ap, Ap), const, pipeline_mode=single),         # W2^T
            pl.BlockSpec((1, Ap), const, pipeline_mode=single),          # b2
        ],
        out_specs=pl.BlockSpec((block_b, Ap), lambda b: (b, 0)),         # lane-dense
        compiler_params=pltpu.CompilerParams(
            dimension_semantics=("parallel",),
            vmem_limit_bytes=vmem_limit),
    )(img_in, qst_in, w_img_t, b_img, w_qst_t, b_qst, w1_t, b1, w2_t, b2)

    return out[:B, :A]


def vqa_reference_f32(img_feat_raw, qst_state, params):
    """Pure-JAX reference mirroring the PyTorch forward (f32, HIGHEST precision)."""
    hp = jax.lax.Precision.HIGHEST
    img = jnp.dot(img_feat_raw, params["w_img"].T, precision=hp) + params["b_img"]
    img = img / jnp.linalg.norm(img, axis=1, keepdims=True)
    qst = jnp.tanh(qst_state)
    qst = jnp.dot(qst, params["w_qst"].T, precision=hp) + params["b_qst"]
    c = jnp.tanh(img * qst)
    c = jnp.dot(c, params["w1"].T, precision=hp) + params["b1"]
    c = jnp.tanh(c)
    c = jnp.dot(c, params["w2"].T, precision=hp) + params["b2"]
    return c


def vqa_reference_bf16(img_feat_raw, qst_state, params):
    """Reference with the same numerics as the kernel (bf16 operands, f32 acc)."""
    bf16, f32 = jnp.bfloat16, jnp.float32
    img = jnp.dot(img_feat_raw.astype(bf16), params["w_img"].T.astype(bf16),
                  preferred_element_type=f32) + params["b_img"]
    img = img * jax.lax.rsqrt(
        jnp.maximum(jnp.sum(img * img, axis=-1, keepdims=True), 1e-12))
    qst = jnp.tanh(qst_state).astype(bf16)
    qst = jnp.dot(qst, params["w_qst"].T.astype(bf16),
                  preferred_element_type=f32) + params["b_qst"]
    c = jnp.tanh(img * qst).astype(bf16)
    c = jnp.dot(c, params["w1"].T.astype(bf16),
                preferred_element_type=f32) + params["b1"]
    c = jnp.tanh(c).astype(bf16)
    c = jnp.dot(c, params["w2"].T.astype(bf16),
                preferred_element_type=f32) + params["b2"]
    return c


if __name__ == "__main__":
    # Small demo shapes consistent with the module; E and A are deliberately
    # NOT multiples of 128 to exercise the wrapper-side lane padding:
    #   B=16, F=256 (truncated VGG19 feature dim), E=96 (embed_size),
    #   num_layers=2, hidden_size=32 -> Q = 2*num_layers*hidden = 128,
    #   A=120 (ans_vocab_size).
    B, F, E, A = 16, 256, 96, 120
    num_layers, hidden_size = 2, 32
    Q = 2 * num_layers * hidden_size

    key = jax.random.PRNGKey(0)
    ks = jax.random.split(key, 10)

    img_feat_raw = jax.random.normal(ks[0], (B, F), dtype=jnp.float32)
    qst_state = jax.random.normal(ks[1], (B, Q), dtype=jnp.float32)

    params = {
        "w_img": 0.05 * jax.random.normal(ks[2], (E, F), dtype=jnp.float32),
        "b_img": 0.05 * jax.random.normal(ks[3], (E,), dtype=jnp.float32),
        "w_qst": 0.05 * jax.random.normal(ks[4], (E, Q), dtype=jnp.float32),
        "b_qst": 0.05 * jax.random.normal(ks[5], (E,), dtype=jnp.float32),
        "w1": 0.05 * jax.random.normal(ks[6], (A, E), dtype=jnp.float32),
        "b1": 0.05 * jax.random.normal(ks[7], (A,), dtype=jnp.float32),
        "w2": 0.05 * jax.random.normal(ks[8], (A, A), dtype=jnp.float32),
        "b2": 0.05 * jax.random.normal(ks[9], (A,), dtype=jnp.float32),
    }

    # Default block_b -> 16 here: single grid step (optimal on 1-TC v5e/v6e).
    u = vqa_forward(img_feat_raw, qst_state, params)
    u = jax.block_until_ready(u)
    assert u.shape == (B, A)

    # Tight check vs a reference with matching bf16-operand / f32-accum numerics.
    u_bf16 = vqa_reference_bf16(img_feat_raw, qst_state, params)
    assert jnp.allclose(u, u_bf16, atol=2e-3, rtol=2e-3), "mismatch vs bf16 reference"

    # Loose semantic check vs the full-precision f32 PyTorch-equivalent forward.
    u_f32 = vqa_reference_f32(img_feat_raw, qst_state, params)
    assert jnp.allclose(u, u_f32, atol=1e-2, rtol=1e-2), "mismatch vs f32 reference"

    print("KERNEL_OK")
</pallas_src>

<mosaic_0001>
module attributes {stable_mosaic.version = 11 : i64} {
  func.func @vqa_head_kernel(%arg0: i32, %arg1: memref<16x256xbf16, #tpu.memory_space<vmem>>, %arg2: memref<16x128xf32, #tpu.memory_space<vmem>>, %arg3: memref<256x128xbf16, #tpu.memory_space<vmem>>, %arg4: memref<1x128xf32, #tpu.memory_space<vmem>>, %arg5: memref<128x128xbf16, #tpu.memory_space<vmem>>, %arg6: memref<1x128xf32, #tpu.memory_space<vmem>>, %arg7: memref<128x128xbf16, #tpu.memory_space<vmem>>, %arg8: memref<1x128xf32, #tpu.memory_space<vmem>>, %arg9: memref<128x128xbf16, #tpu.memory_space<vmem>>, %arg10: memref<1x128xf32, #tpu.memory_space<vmem>>, %arg11: memref<16x128xf32, #tpu.memory_space<vmem>>) attributes {dimension_semantics = [#tpu.dimension_semantics<parallel>], iteration_bounds = array<i64: 1>, scalar_prefetch = 0 : i64, scratch_operands = 0 : i64, tpu.core_type = #tpu.core_type<tc>, window_params = [{transform_indices = @transform_0, window_bounds = array<i64: 16, 256>}, {transform_indices = @transform_1, window_bounds = array<i64: 16, 128>}, {pipeline_mode = #tpu.pipeline_mode<synchronous>, transform_indices = @transform_2, window_bounds = array<i64: 256, 128>}, {pipeline_mode = #tpu.pipeline_mode<synchronous>, transform_indices = @transform_3, window_bounds = array<i64: 1, 128>}, {pipeline_mode = #tpu.pipeline_mode<synchronous>, transform_indices = @transform_4, window_bounds = array<i64: 128, 128>}, {pipeline_mode = #tpu.pipeline_mode<synchronous>, transform_indices = @transform_5, window_bounds = array<i64: 1, 128>}, {pipeline_mode = #tpu.pipeline_mode<synchronous>, transform_indices = @transform_6, window_bounds = array<i64: 128, 128>}, {pipeline_mode = #tpu.pipeline_mode<synchronous>, transform_indices = @transform_7, window_bounds = array<i64: 1, 128>}, {pipeline_mode = #tpu.pipeline_mode<synchronous>, transform_indices = @transform_8, window_bounds = array<i64: 128, 128>}, {pipeline_mode = #tpu.pipeline_mode<synchronous>, transform_indices = @transform_9, window_bounds = array<i64: 1, 128>}, {transform_indices = @transform_10, window_bounds = array<i64: 16, 128>}]} {
    %c0 = arith.constant 0 : index
    %c0_0 = arith.constant 0 : index
    %0 = vector.load %arg1[%c0, %c0_0] : memref<16x256xbf16, #tpu.memory_space<vmem>>, vector<16x256xbf16>
    %c0_1 = arith.constant 0 : index
    %c0_2 = arith.constant 0 : index
    %1 = vector.load %arg3[%c0_1, %c0_2] : memref<256x128xbf16, #tpu.memory_space<vmem>>, vector<256x128xbf16>
    %cst = arith.constant dense<0.000000e+00> : vector<16x128xf32>
    %2 = tpu.matmul %0, %1, %cst {dimension_numbers = #tpu.dot_dimension_numbers<[1], [0], [0], [1], [0, 0, 1, 1], [], []>} : vector<16x256xbf16>, vector<256x128xbf16>, vector<16x128xf32> -> vector<16x128xf32>
    %c0_3 = arith.constant 0 : index
    %c0_4 = arith.constant 0 : index
    %3 = vector.load %arg4[%c0_3, %c0_4] : memref<1x128xf32, #tpu.memory_space<vmem>>, vector<1x128xf32>
    %4 = vector.broadcast %3 : vector<1x128xf32> to vector<16x128xf32>
    %5 = arith.addf %2, %4 : vector<16x128xf32>
    %6 = arith.mulf %5, %5 : vector<16x128xf32>
    %cst_5 = arith.constant dense<0.000000e+00> : vector<16xf32>
    %7 = vector.multi_reduction <add>, %6, %cst_5 [1] : vector<16x128xf32> to vector<16xf32>
    %8 = vector.shape_cast %7 : vector<16xf32> to vector<16x1xf32>
    %cst_6 = arith.constant 9.99999996E-13 : f32
    %9 = vector.broadcast %cst_6 : f32 to vector<16x1xf32>
    %10 = arith.maximumf %8, %9 : vector<16x1xf32>
    %11 = math.rsqrt %10 : vector<16x1xf32>
    %12 = vector.broadcast %11 : vector<16x1xf32> to vector<16x128xf32>
    %13 = arith.mulf %5, %12 : vector<16x128xf32>
    %c0_7 = arith.constant 0 : index
    %c0_8 = arith.constant 0 : index
    %14 = vector.load %arg2[%c0_7, %c0_8] : memref<16x128xf32, #tpu.memory_space<vmem>>, vector<16x128xf32>
    %15 = math.tanh %14 : vector<16x128xf32>
    %16 = arith.truncf %15 : vector<16x128xf32> to vector<16x128xbf16>
    %c0_9 = arith.constant 0 : index
    %c0_10 = arith.constant 0 : index
    %17 = vector.load %arg5[%c0_9, %c0_10] : memref<128x128xbf16, #tpu.memory_space<vmem>>, vector<128x128xbf16>
    %cst_11 = arith.constant dense<0.000000e+00> : vector<16x128xf32>
    %18 = tpu.matmul %16, %17, %cst_11 {dimension_numbers = #tpu.dot_dimension_numbers<[1], [0], [0], [1], [0, 0, 1, 1], [], []>} : vector<16x128xbf16>, vector<128x128xbf16>, vector<16x128xf32> -> vector<16x128xf32>
    %c0_12 = arith.constant 0 : index
    %c0_13 = arith.constant 0 : index
    %19 = vector.load %arg6[%c0_12, %c0_13] : memref<1x128xf32, #tpu.memory_space<vmem>>, vector<1x128xf32>
    %20 = vector.broadcast %19 : vector<1x128xf32> to vector<16x128xf32>
    %21 = arith.addf %18, %20 : vector<16x128xf32>
    %22 = arith.mulf %13, %21 : vector<16x128xf32>
    %23 = math.tanh %22 : vector<16x128xf32>
    %24 = arith.truncf %23 : vector<16x128xf32> to vector<16x128xbf16>
    %c0_14 = arith.constant 0 : index
    %c0_15 = arith.constant 0 : index
    %25 = vector.load %arg7[%c0_14, %c0_15] : memref<128x128xbf16, #tpu.memory_space<vmem>>, vector<128x128xbf16>
    %cst_16 = arith.constant dense<0.000000e+00> : vector<16x128xf32>
    %26 = tpu.matmul %24, %25, %cst_16 {dimension_numbers = #tpu.dot_dimension_numbers<[1], [0], [0], [1], [0, 0, 1, 1], [], []>} : vector<16x128xbf16>, vector<128x128xbf16>, vector<16x128xf32> -> vector<16x128xf32>
    %c0_17 = arith.constant 0 : index
    %c0_18 = arith.constant 0 : index
    %27 = vector.load %arg8[%c0_17, %c0_18] : memref<1x128xf32, #tpu.memory_space<vmem>>, vector<1x128xf32>
    %28 = vector.broadcast %27 : vector<1x128xf32> to vector<16x128xf32>
    %29 = arith.addf %26, %28 : vector<16x128xf32>
    %30 = math.tanh %29 : vector<16x128xf32>
    %31 = arith.truncf %30 : vector<16x128xf32> to vector<16x128xbf16>
    %c0_19 = arith.constant 0 : index
    %c0_20 = arith.constant 0 : index
    %32 = vector.load %arg9[%c0_19, %c0_20] : memref<128x128xbf16, #tpu.memory_space<vmem>>, vector<128x128xbf16>
    %cst_21 = arith.constant dense<0.000000e+00> : vector<16x128xf32>
    %33 = tpu.matmul %31, %32, %cst_21 {dimension_numbers = #tpu.dot_dimension_numbers<[1], [0], [0], [1], [0, 0, 1, 1], [], []>} : vector<16x128xbf16>, vector<128x128xbf16>, vector<16x128xf32> -> vector<16x128xf32>
    %c0_22 = arith.constant 0 : index
    %c0_23 = arith.constant 0 : index
    %34 = vector.load %arg10[%c0_22, %c0_23] : memref<1x128xf32, #tpu.memory_space<vmem>>, vector<1x128xf32>
    %35 = vector.broadcast %34 : vector<1x128xf32> to vector<16x128xf32>
    %36 = arith.addf %33, %35 : vector<16x128xf32>
    %c0_24 = arith.constant 0 : index
    %c0_25 = arith.constant 0 : index
    %37 = vector.load %arg11[%c0_24, %c0_25] : memref<16x128xf32, #tpu.memory_space<vmem>>, vector<16x128xf32>
    tpu.vector_store %arg11[%c0_24, %c0_25], %36 {strides = array<i32>} : memref<16x128xf32, #tpu.memory_space<vmem>>, vector<16x128xf32>,
    return
  }
  func.func @transform_0(%arg0: i32) -> (i32, i32) {
    %c0_i32 = arith.constant 0 : i32
    %c0_i32_0 = arith.constant 0 : i32
    return %arg0, %c0_i32 : i32, i32
  }
  func.func @transform_1(%arg0: i32) -> (i32, i32) {
    %c0_i32 = arith.constant 0 : i32
    %c0_i32_0 = arith.constant 0 : i32
    return %arg0, %c0_i32 : i32, i32
  }
  func.func @transform_2(%arg0: i32) -> (i32, i32) {
    %c0_i32 = arith.constant 0 : i32
    %c0_i32_0 = arith.constant 0 : i32
    %c0_i32_1 = arith.constant 0 : i32
    return %c0_i32, %c0_i32_0 : i32, i32
  }
  func.func @transform_3(%arg0: i32) -> (i32, i32) {
    %c0_i32 = arith.constant 0 : i32
    %c0_i32_0 = arith.constant 0 : i32
    %c0_i32_1 = arith.constant 0 : i32
    return %c0_i32, %c0_i32_0 : i32, i32
  }
  func.func @transform_4(%arg0: i32) -> (i32, i32) {
    %c0_i32 = arith.constant 0 : i32
    %c0_i32_0 = arith.constant 0 : i32
    %c0_i32_1 = arith.constant 0 : i32
    return %c0_i32, %c0_i32_0 : i32, i32
  }
  func.func @transform_5(%arg0: i32) -> (i32, i32) {
    %c0_i32 = arith.constant 0 : i32
    %c0_i32_0 = arith.constant 0 : i32
    %c0_i32_1 = arith.constant 0 : i32
    return %c0_i32, %c0_i32_0 : i32, i32
  }
  func.func @transform_6(%arg0: i32) -> (i32, i32) {
    %c0_i32 = arith.constant 0 : i32
    %c0_i32_0 = arith.constant 0 : i32
    %c0_i32_1 = arith.constant 0 : i32
    return %c0_i32, %c0_i32_0 : i32, i32
  }
  func.func @transform_7(%arg0: i32) -> (i32, i32) {
    %c0_i32 = arith.constant 0 : i32
    %c0_i32_0 = arith.constant 0 : i32
    %c0_i32_1 = arith.constant 0 : i32
    return %c0_i32, %c0_i32_0 : i32, i32
  }
  func.func @transform_8(%arg0: i32) -> (i32, i32) {
    %c0_i32 = arith.constant 0 : i32
    %c0_i32_0 = arith.constant 0 : i32
    %c0_i32_1 = arith.constant 0 : i32
    return %c0_i32, %c0_i32_0 : i32, i32
  }
  func.func @transform_9(%arg0: i32) -> (i32, i32) {
    %c0_i32 = arith.constant 0 : i32
    %c0_i32_0 = arith.constant 0 : i32
    %c0_i32_1 = arith.constant 0 : i32
    return %c0_i32, %c0_i32_0 : i32, i32
  }
  func.func @transform_10(%arg0: i32) -> (i32, i32) {
    %c0_i32 = arith.constant 0 : i32
    %c0_i32_0 = arith.constant 0 : i32
    return %arg0, %c0_i32 : i32, i32
  }
}

</mosaic_0001>

<bundles_post_ra>
// kernel: tpu_custom_call.1
= control target key start
LH: loop header
LB: loop body
LE: loop exit
PB: predicated region body
PF: predicated region fallthrough
CT: control target
= control target key end

     0   :  { %15 = vsyncpa [#allocation3], 0  ;;  %s1296_s0 = inlined_call_operand.hbm [shape: bf16[16,256], index: 0, kind: input, shape index: {}]   ;;  %s1297_s1 = inlined_call_operand.hbm [shape: f32[16,128], index: 1, kind: input, shape index: {}]   ;;  %s1298_s2 = inlined_call_operand.hbm [shape: bf16[256,128], index: 2, kind: input, shape index: {}]   ;;  %s1299_s3 = inlined_call_operand.vmem [shape: f32[1,128], index: 3, kind: input, shape index: {}]   ;;  %s1300_s4 = inlined_call_operand.hbm [shape: bf16[128,128], index: 4, kind: input, shape index: {}]   ;;  %s1301_s5 = inlined_call_operand.vmem [shape: f32[1,128], index: 5, kind: input, shape index: {}]   ;;  %s1302_s6 = inlined_call_operand.hbm [shape: bf16[128,128], index: 6, kind: input, shape index: {}]   ;;  %s1303_s7 = inlined_call_operand.vmem [shape: f32[1,128], index: 7, kind: input, shape index: {}]   ;;  %s1304_s8 = inlined_call_operand.hbm [shape: bf16[128,128], index: 8, kind: input, shape index: {}]   ;;  %s1305_s9 = inlined_call_operand.vmem [shape: f32[1,128], index: 9, kind: input, shape index: {}]   ;;  %s1306_s10 = inlined_call_operand.hbm [shape: f32[16,128], index: 10, kind: output, shape index: {}]  }
   0x1   :  { %16 = vsyncpa [#allocation6], 0 }
   0x2   :  { %17 = vsyncpa [#allocation9], 0 }
   0x3   :  { %18 = vsyncpa [#allocation12], 0 }
   0x4   :  { %19 = vsyncpa [#allocation4], 0  ;;  %s1081_s13 = smov [#allocation5]   ;;  %s917_s17 = scalar_lea.hbm %s1297_s1, 256 }
   0x5   :  { %s37_s14 = sshll.u32 %s1081_s13, 4  ;;  %p918_p0 = scmp.ne.s32.totalorder %s1297_s1, %s917_s17  ;;  %s38_s14 = int_to_ptr.vmem [resolvable:$true] %s37_s14 }
   0x6   :  { %p921_p1 = scmp.lt.u32.totalorder %s917_s17, %s1297_s1 }
   0x8   :  { %p923_p2 = pnand %p921_p1, %p918_p0 }
   0xa   :  { %926 = shalt.err (!%p923_p2)
}
   0xb   :  { %s927_s22 = scalar_lea.vmem %s38_s14, 256  ;;  %p932_p4 = scmp.lt.s32.totalorder %s38_s14, %s38_s14 }
   0xc   :  { %p928_p3 = scmp.ne.s32.totalorder %s38_s14, %s927_s22  ;;  %p933_p5 = scmp.lt.s32.totalorder %s927_s22, %s927_s22 }
   0xe   :  { %p934_p6 = por %p933_p5, %p932_p4 }
  0x10   :  { %p935_p7 = pnand %p934_p6, %p928_p3 }
  0x12   :  { %938 = shalt.err (!%p935_p7)
}
  0x13   :  { %s1082_s23 = smov 128   ;;  %s1083_s24 = smov 8  }
  0x14   :  { %43 = dma.hbm_to_vmem [thread:$0]  %s1297_s1, 256, %s38_s14, [#allocation6], %s1082_s23, %s1082_s23, %s1083_s24  }
  0x15   :  { %s1084_s27 = smov [#allocation8]   ;;  %s1085_s29 = smov [#allocation2]  }
  0x16   :  { %s63_s28 = sshll.u32 %s1084_s27, 4  ;;  %s25_s30 = sshll.u32 %s1085_s29, 4  ;;  %s64_s28 = int_to_ptr.vmem [resolvable:$true] %s63_s28  ;;  %s26_s30 = int_to_ptr.vmem [resolvable:$true] %s25_s30 }
  0x17   :  { %s939_s13 = scalar_lea.hbm %s1300_s4, 1024 }
  0x18   :  { %p940_p8 = scmp.ne.s32.totalorder %s1300_s4, %s939_s13  ;;  %p943_p9 = scmp.lt.u32.totalorder %s939_s13, %s1300_s4 }
  0x1a   :  { %p945_p10 = pnand %p943_p9, %p940_p8 }
  0x1c   :  { %948 = shalt.err (!%p945_p10)
}
  0x1d   :  { %s949_s1 = scalar_lea.vmem %s64_s28, 1024  ;;  %p954_p12 = scmp.lt.s32.totalorder %s64_s28, %s64_s28 }
  0x1e   :  { %p950_p11 = scmp.ne.s32.totalorder %s64_s28, %s949_s1  ;;  %p955_p13 = scmp.lt.s32.totalorder %s949_s1, %s949_s1 }
  0x20   :  { %p956_p0 = por %p955_p13, %p954_p12 }
  0x22   :  { %p957_p1 = pnand %p956_p0, %p950_p11 }
  0x24   :  { %960 = shalt.err (!%p957_p1)
}
  0x25   :  { %s1086_s14 = smov 64   ;;  %s1087_s19 = smov 4  }
  0x26   :  { %69 = dma.hbm_to_vmem [thread:$0]  %s1300_s4, 1024, %s64_s28, [#allocation9], %s1086_s14, %s1086_s14, %s1087_s19  }
  0x27   :  { %s961_s26 = scalar_lea.hbm %s1296_s0, 256 }
  0x28   :  { %p962_p2 = scmp.ne.s32.totalorder %s1296_s0, %s961_s26  ;;  %p965_p3 = scmp.lt.u32.totalorder %s961_s26, %s1296_s0 }
  0x2a   :  { %p967_p4 = pnand %p965_p3, %p962_p2 }
  0x2c   :  { %970 = shalt.err (!%p967_p4)
}
  0x2d   :  { %s971_s13 = scalar_lea.vmem %s26_s30, 256  ;;  %p976_p6 = scmp.lt.s32.totalorder %s26_s30, %s26_s30 }
  0x2e   :  { %p972_p5 = scmp.ne.s32.totalorder %s26_s30, %s971_s13  ;;  %p977_p7 = scmp.lt.s32.totalorder %s971_s13, %s971_s13 }
  0x30   :  { %p978_p8 = por %p977_p7, %p976_p6 }
  0x32   :  { %p979_p9 = pnand %p978_p8, %p972_p5 }
  0x34   :  { %982 = shalt.err (!%p979_p9)
}
  0x35   :  { %31 = dma.hbm_to_vmem [thread:$0]  %s1296_s0, 256, %s26_s30, [#allocation3], %s1082_s23, %s1082_s23, %s1083_s24  }
  0x36   :  { %s1088_s15 = smov [#allocation7]   ;;  %s1089_s17 = smov [#allocation10]  }
  0x37   :  { %s49_s16 = sshll.u32 %s1088_s15, 4  ;;  %s77_s18 = sshll.u32 %s1089_s17, 4  ;;  %s50_s16 = int_to_ptr.vmem [resolvable:$true] %s49_s16  ;;  %s78_s18 = int_to_ptr.vmem [resolvable:$true] %s77_s18 }
  0x38   :  { %s983_s21 = scalar_lea.hbm %s1298_s2, 2048 }
  0x39   :  { %p984_p10 = scmp.ne.s32.totalorder %s1298_s2, %s983_s21  ;;  %p987_p11 = scmp.lt.u32.totalorder %s983_s21, %s1298_s2 }
  0x3b   :  { %p989_p12 = pnand %p987_p11, %p984_p10 }
  0x3d   :  { %992 = shalt.err (!%p989_p12)
}
  0x3e   :  { %s993_s0 = scalar_lea.vmem %s50_s16, 2048  ;;  %p998_p0 = scmp.lt.s32.totalorder %s50_s16, %s50_s16 }
  0x3f   :  { %p994_p13 = scmp.ne.s32.totalorder %s50_s16, %s993_s0  ;;  %p999_p1 = scmp.lt.s32.totalorder %s993_s0, %s993_s0 }
  0x41   :  { %p1000_p2 = por %p999_p1, %p998_p0 }
  0x43   :  { %p1001_p3 = pnand %p1000_p2, %p994_p13 }
  0x45   :  { %1004 = shalt.err (!%p1001_p3)
}
  0x46   :  { %55 = dma.hbm_to_vmem [thread:$0]  %s1298_s2, 2048, %s50_s16, [#allocation6], %s1086_s14, %s1086_s14, %s1087_s19  }
  0x47   :  { %s1005_s13 = scalar_lea.hbm %s1302_s6, 1024 }
  0x48   :  { %p1006_p4 = scmp.ne.s32.totalorder %s1302_s6, %s1005_s13  ;;  %p1009_p5 = scmp.lt.u32.totalorder %s1005_s13, %s1302_s6 }
  0x4a   :  { %p1011_p6 = pnand %p1009_p5, %p1006_p4 }
  0x4c   :  { %1014 = shalt.err (!%p1011_p6)
}
  0x4d   :  { %s1015_s1 = scalar_lea.vmem %s78_s18, 1024  ;;  %p1020_p8 = scmp.lt.s32.totalorder %s78_s18, %s78_s18 }
  0x4e   :  { %p1016_p7 = scmp.ne.s32.totalorder %s78_s18, %s1015_s1  ;;  %p1021_p9 = scmp.lt.s32.totalorder %s1015_s1, %s1015_s1 }
  0x50   :  { %p1022_p10 = por %p1021_p9, %p1020_p8 }
  0x52   :  { %p1023_p11 = pnand %p1022_p10, %p1016_p7 }
  0x54   :  { %1026 = shalt.err (!%p1023_p11)
}
  0x55   :  { %83 = dma.hbm_to_vmem [thread:$0]  %s1302_s6, 1024, %s78_s18, [#allocation9], %s1086_s14, %s1086_s14, %s1087_s19  }
  0x56   :  { %s1090_s20 = smov [#allocation11]   ;;  %s1027_s26 = scalar_lea.hbm %s1304_s8, 1024 }
  0x57   :  { %s91_s21 = sshll.u32 %s1090_s20, 4  ;;  %p1028_p12 = scmp.ne.s32.totalorder %s1304_s8, %s1027_s26  ;;  %s92_s21 = int_to_ptr.vmem [resolvable:$true] %s91_s21 }
  0x58   :  { %p1031_p13 = scmp.lt.u32.totalorder %s1027_s26, %s1304_s8 }
  0x5a   :  { %p1033_p0 = pnand %p1031_p13, %p1028_p12 }
  0x5c   :  { %1036 = shalt.err (!%p1033_p0)
}
  0x5d   :  { %s1037_s11 = scalar_lea.vmem %s92_s21, 1024  ;;  %p1042_p2 = scmp.lt.s32.totalorder %s92_s21, %s92_s21 }
  0x5e   :  { %p1038_p1 = scmp.ne.s32.totalorder %s92_s21, %s1037_s11  ;;  %p1043_p3 = scmp.lt.s32.totalorder %s1037_s11, %s1037_s11 }
  0x60   :  { %p1044_p4 = por %p1043_p3, %p1042_p2 }
  0x62   :  { %p1045_p5 = pnand %p1044_p4, %p1038_p1 }
  0x64   :  { %1048 = shalt.err (!%p1045_p5)
}
  0x65   :  { %97 = dma.hbm_to_vmem [thread:$0]  %s1304_s8, 1024, %s92_s21, [#allocation12], %s1086_s14, %s1086_s14, %s1087_s19  }
  0x66   :  { %1071 = dma.done.wait [#allocation3], 256  }
  0x67   :  { %1072 = vsyncadd [#allocation3], 4294967040 }
  0x68   :  { %1073 = dma.done.wait [#allocation6], 2304  }
  0x69   :  { %1074 = vsyncadd [#allocation6], 4294964992 }
  0x6a   :  { %1075 = dma.done.wait [#allocation9], 2048  }
  0x6b   :  { %1076 = vsyncadd [#allocation9], 4294965248 }
  0x6c   :  { %1077 = dma.done.wait [#allocation12], 1024  }
  0x6d   :  { %1078 = vsyncadd [#allocation12], 4294966272  ;;  %v1091_v0 = vmov 0.0   ;;  %vm1092_vm0 = vmmov 0   ;;  %v858_v1 = vld [vmem:[#allocation7 + $0x40] sm:$0xff]   ;;  %v860_v3 = vld [vmem:[#allocation7 + $0x48] sm:$0xff]  }
  0x6e   :  { %785 = vmatprep.subr.bf16.mxu1 %v1091_v0  ;;  %801 = vmatprep.mubr.msk.bf16.mxu1 %vm1092_vm0, %v1091_v0  ;;  %v859_v2 = vld [vmem:[#allocation7] sm:$0xff]   ;;  %v861_v4 = vld [vmem:[#allocation7 + $0x8] sm:$0xff]   ;;  %v862_v5 = vld [vmem:[#allocation7 + $0x50] sm:$0xff]   ;;  %s1093_s28 = smov [#allocation13]  }
  0x6f   :  { %736 = vmatprep.subr.bf16.mxu0 %v858_v1  ;;  %v863_v6 = vld [vmem:[#allocation7 + $0x10] sm:$0xff]   ;;  %v864_v7 = vld [vmem:[#allocation7 + $0x58] sm:$0xff]   ;;  %v866_v9 = vld [vmem:[#allocation7 + $0x60] sm:$0xff]   ;;  %s675_s15 = sshll.u32 %s1093_s28, 4  ;;  %s676_s15 = int_to_ptr.vmem [resolvable:$true] %s675_s15 }
  0x70   :  { %737 = vmatpush3.bf16.msra.mxu0 %v859_v2  ;;  %v865_v8 = vld [vmem:[#allocation7 + $0x18] sm:$0xff]   ;;  %v867_v10 = vld [vmem:[#allocation7 + $0x20] sm:$0xff]   ;;  %v868_v11 = vld [vmem:[#allocation7 + $0x68] sm:$0xff]   ;;  %p1054_p7 = scmp.lt.s32.totalorder %s676_s15, %s676_s15 }
  0x71   :  { %738 = vmatprep.subr.bf16.mxu0 %v860_v3  ;;  %v869_v12 = vld [vmem:[#allocation7 + $0x28] sm:$0xff]   ;;  %v877_v14 = vld [vmem:[#allocation8] sm:$0xff]   ;;  %v870_v15 = vld [vmem:[#allocation7 + $0x70] sm:$0xff]  }
  0x72   :  { %v876_v13 = vld [vmem:[#allocation2 + $0x4] ss:$8 sps:$4 sm:$0xff]   ;;  %786 = vmatpush3.bf16.msra.mxu1 %v877_v14  ;;  %v871_v17 = vld [vmem:[#allocation7 + $0x30] sm:$0xff]   ;;  %v872_v18 = vld [vmem:[#allocation7 + $0x78] sm:$0xff]  }
  0x73   :  { %298 = vmatprep.mubr.bf16.mxu0 %v876_v13  ;;  %v878_v16 = vld [vmem:[#allocation8 + $0x8] sm:$0xff]   ;;  %787 = vmatprep.subr.bf16.mxu1 %v1091_v0  ;;  %v879_v19 = vld [vmem:[#allocation8 + $0x10] sm:$0xff]   ;;  %v873_v20 = vld [vmem:[#allocation7 + $0x38] sm:$0xff]  }
  0x74   :  { %739 = vmatpush3.bf16.msra.mxu0 %v861_v4  ;;  %v880_v21 = vld [vmem:[#allocation8 + $0x18] sm:$0xff]   ;;  %v874_v22 = vld [vmem:[#allocation2] ss:$8 sps:$4 sm:$0xff]   ;;  %v319_v23 = vld [vmem:[#allocation5] sm:$0xff] }
  0x75   :  { %740 = vmatprep.subr.bf16.mxu0 %v862_v5  ;;  %v320_v24 = vld [vmem:[#allocation5 + $0x8] sm:$0xff]  ;;  %v881_v25 = vld [vmem:[#allocation8 + $0x20] sm:$0xff]   ;;  %901 = vtanh.f32 %v319_v23  ;;  %v882_v26 = vld [vmem:[#allocation8 + $0x28] sm:$0xff]  }
  0x76   :  { %788 = vmatpush3.bf16.msra.mxu1 %v878_v16  ;;  %903 = vtanh.f32 %v320_v24  ;;  %v883_v27 = vld [vmem:[#allocation8 + $0x30] sm:$0xff]   ;;  %v884_v30 = vld [vmem:[#allocation8 + $0x38] sm:$0xff]   ;;  %v690_v34 = vld [vmem:[%s1299_s3] ss:$0 sm:$0xff] }
  0x77   :  { %789 = vmatprep.subr.bf16.mxu1 %v1091_v0  ;;  %v885_v43 = vld [vmem:[#allocation10] sm:$0xff]   ;;  %v886_v44 = vld [vmem:[#allocation10 + $0x8] sm:$0xff]   ;;  %v887_v45 = vld [vmem:[#allocation10 + $0x10] sm:$0xff]  }
  0x78   :  { %741 = vmatpush3.bf16.msra.mxu0 %v863_v6  ;;  %v888_v49 = vld [vmem:[#allocation10 + $0x18] sm:$0xff]   ;;  %v889_v51 = vld [vmem:[#allocation10 + $0x20] sm:$0xff]   ;;  %v890_v52 = vld [vmem:[#allocation10 + $0x28] sm:$0xff]  }
  0x79   :  { %742 = vmatprep.subr.bf16.mxu0 %v864_v7  ;;  %v891_v53 = vld [vmem:[#allocation10 + $0x30] sm:$0xff]   ;;  %v892_v54 = vld [vmem:[#allocation10 + $0x38] sm:$0xff]   ;;  %v893_v55 = vld [vmem:[#allocation11] sm:$0xff]  }
  0x7a   :  { %790 = vmatpush3.bf16.msra.mxu1 %v879_v19  ;;  %v894_v56 = vld [vmem:[#allocation11 + $0x8] sm:$0xff]   ;;  %v895_v57 = vld [vmem:[#allocation11 + $0x10] sm:$0xff]   ;;  %v896_v58 = vld [vmem:[#allocation11 + $0x18] sm:$0xff]  }
  0x7b   :  { %791 = vmatprep.subr.bf16.mxu1 %v1091_v0  ;;  %v709_v63 = vld [vmem:[%s1301_s5] ss:$0 sm:$0xff]  ;;  %v898_v13 = vld [vmem:[#allocation11 + $0x28] sm:$0xff]   ;;  %v899_v14 = vld [vmem:[#allocation11 + $0x30] sm:$0xff]  }
  0x7c   :  { %743 = vmatpush3.bf16.msra.mxu0 %v865_v8  ;;  %v718_v16 = vld [vmem:[%s1303_s7] ss:$0 sm:$0xff]  ;;  %s1049_s7 = scalar_lea.vmem %s676_s15, 256 }
  0x7d   :  { %744 = vmatprep.subr.bf16.mxu0 %v866_v9  ;;  %p1050_p6 = scmp.ne.s32.totalorder %s676_s15, %s1049_s7  ;;  %p1055_p8 = scmp.lt.s32.totalorder %s1049_s7, %s1049_s7 }
  0x7e   :  { %792 = vmatpush3.bf16.msra.mxu1 %v880_v21 }
  0x7f   :  { %793 = vmatprep.subr.bf16.mxu1 %v1091_v0  ;;  %v902_v28 = vpop.eup %901  ;;  %p1056_p9 = por %p1055_p8, %p1054_p7 }
  0x80   :  { %745 = vmatpush3.bf16.msra.mxu0 %v867_v10  ;;  %v904_v29 = vpop.eup %903 }
  0x81   :  { %746 = vmatprep.subr.bf16.mxu0 %v868_v11  ;;  %v323_v31 = vpack.c.bf16 %v904_v29, %v902_v28  ;;  %p1057_p10 = pnand %p1056_p9, %p1050_p6 }
  0x82   :  { %794 = vmatpush3.bf16.msra.mxu1 %v881_v25 }
  0x83   :  { %795 = vmatprep.subr.bf16.mxu1 %v1091_v0 }
  0x84   :  { %747 = vmatpush3.bf16.msra.mxu0 %v869_v12  ;;  %v897_v12 = vld [vmem:[#allocation11 + $0x20] sm:$0xff]  }
  0x85   :  { %748 = vmatprep.subr.bf16.mxu0 %v870_v15  ;;  %v900_v15 = vld [vmem:[#allocation11 + $0x38] sm:$0xff]  }
  0x86   :  { %796 = vmatpush3.bf16.msra.mxu1 %v882_v26 }
  0x87   :  { %797 = vmatprep.subr.bf16.mxu1 %v1091_v0 }
  0x88   :  { %749 = vmatpush3.bf16.msra.mxu0 %v871_v17 }
  0x89   :  { %750 = vmatprep.subr.bf16.mxu0 %v872_v18 }
  0x8a   :  { %798 = vmatpush3.bf16.msra.mxu1 %v883_v27 }
  0x8b   :  { %799 = vmatprep.subr.bf16.mxu1 %v1091_v0 }
  0x8c   :  { %751 = vmatpush3.bf16.msra.mxu0 %v873_v20 }
  0x8d   :  { %805 = vmatprep.subr.bf16.mxu0 %v1091_v0 }
  0x8e   :  { %800 = vmatpush3.bf16.msra.mxu1 %v884_v30 }
  0x8f   :  { %299 = vmatmul.mubr.bf16.vlgmr.msra.gmra.mrb[0].mxu0 %v874_v22  ;;  %825 = vmatprep.subr.bf16.mxu1 %v1091_v0 }
  0x90   :  { %821 = vmatprep.mubr.msk.bf16.mxu0 %vm1092_vm0, %v1091_v0  ;;  %806 = vmatpush3.bf16.msra.mxu0 %v885_v43 }
  0x91   :  { %802 = vmatmul.mubr.bf16.vlgmr.msra.gmra.mrb[0].mxu1 %v323_v31  ;;  %807 = vmatprep.subr.bf16.mxu0 %v1091_v0 }
  0x92   :  { %841 = vmatprep.mubr.msk.bf16.mxu1 %vm1092_vm0, %v1091_v0  ;;  %826 = vmatpush3.bf16.msra.mxu1 %v893_v55 }
  0x93   :  { %827 = vmatprep.subr.bf16.mxu1 %v1091_v0 }
  0x94   :  { %808 = vmatpush3.bf16.msra.mxu0 %v886_v44 }
  0x95   :  { %809 = vmatprep.subr.bf16.mxu0 %v1091_v0 }
  0x96   :  { %828 = vmatpush3.bf16.msra.mxu1 %v894_v56 }
  0x97   :  { %829 = vmatprep.subr.bf16.mxu1 %v1091_v0 }
  0x98   :  { %810 = vmatpush3.bf16.msra.mxu0 %v887_v45 }
  0x99   :  { %811 = vmatprep.subr.bf16.mxu0 %v1091_v0 }
  0x9a   :  { %830 = vmatpush3.bf16.msra.mxu1 %v895_v57 }
  0x9b   :  { %831 = vmatprep.subr.bf16.mxu1 %v1091_v0 }
  0x9c   :  { %812 = vmatpush3.bf16.msra.mxu0 %v888_v49 }
  0x9d   :  { %813 = vmatprep.subr.bf16.mxu0 %v1091_v0 }
  0x9e   :  { %832 = vmatpush3.bf16.msra.mxu1 %v896_v58 }
  0x9f   :  { %833 = vmatprep.subr.bf16.mxu1 %v1091_v0 }
  0xa0   :  { %814 = vmatpush3.bf16.msra.mxu0 %v889_v51 }
  0xa1   :  { %815 = vmatprep.subr.bf16.mxu0 %v1091_v0 }
  0xa2   :  { %834 = vmatpush3.bf16.msra.mxu1 %v897_v12 }
  0xa3   :  { %835 = vmatprep.subr.bf16.mxu1 %v1091_v0 }
  0xa4   :  { %816 = vmatpush3.bf16.msra.mxu0 %v890_v52 }
  0xa5   :  { %817 = vmatprep.subr.bf16.mxu0 %v1091_v0 }
  0xa6   :  { %836 = vmatpush3.bf16.msra.mxu1 %v898_v13 }
  0xa7   :  { %837 = vmatprep.subr.bf16.mxu1 %v1091_v0 }
  0xa8   :  { %818 = vmatpush3.bf16.msra.mxu0 %v891_v53 }
  0xa9   :  { %819 = vmatprep.subr.bf16.mxu0 %v1091_v0 }
  0xaa   :  { %838 = vmatpush3.bf16.msra.mxu1 %v899_v14 }
  0xab   :  { %839 = vmatprep.subr.bf16.mxu1 %v1091_v0  ;;  %v727_v0 = vld [vmem:[%s1305_s9] ss:$0 sm:$0xff] }
  0xac   :  { %820 = vmatpush3.bf16.msra.mxu0 %v892_v54 }
  0xae   :  { %840 = vmatpush3.bf16.msra.mxu1 %v900_v15 }
 0x162   :  { %v752_v32 = vpop.f32.mrb[0].mxu0 }
 0x163   :  { %v753_v33 = vpop.f32.mrb[1].mxu0 }
 0x164   :  { %v754_v35 = vadd.f32 %v753_v33, %v752_v32  ;;  %v755_v36 = vpop.f32.mrb[2].mxu0  ;;  %v429_v46 = vpop.f32.mrb[0].mxu1 }
 0x165   :  { %v756_v37 = vpop.f32.mrb[3].mxu0  ;;  %v803_v47 = vpop.f32.mrb[1].mxu1  ;;  %v430_v2 = vadd.f32 %v709_v63, %v429_v46 }
 0x166   :  { %v757_v38 = vadd.f32 %v756_v37, %v755_v36  ;;  %v301_v39 = vadd.f32 %v754_v35, %v690_v34  ;;  %v432_v48 = vpop.f32.mrb[2].mxu1 }
 0x167   :  { %v804_v50 = vpop.f32.mrb[3].mxu1  ;;  %v433_v7 = vadd.f32 %v709_v63, %v432_v48 }
 0x168   :  { %v304_v40 = vadd.f32 %v757_v38, %v690_v34  ;;  %v307_v41 = vmul.f32 %v301_v39, %v301_v39 }
 0x16a   :  { %309 = vadd.xlane.f32.xlu0 %v307_v41  ;;  %v308_v42 = vmul.f32 %v304_v40, %v304_v40 }
 0x16e   :  { %311 = vadd.xlane.f32.xlu0 %v308_v42 }
 0x1f7   :  { %v310_v59 = vpop.xlane.xlu0 %309 }
 0x1f8   :  { %v313_v60 = vmax.f32 %v310_v59, 1e-12 }
 0x1fa   :  { %905 = vrsqrt.f32 %v313_v60 }
 0x1fb   :  { %v312_v61 = vpop.xlane.xlu0 %311 }
 0x1fc   :  { %v314_v62 = vmax.f32 %v312_v61, 1e-12 }
 0x1fe   :  { %907 = vrsqrt.f32 %v314_v62 }
 0x204   :  { %v906_v1 = vpop.eup %905 }
 0x205   :  { %v317_v3 = vmul.f32 %v906_v1, %v301_v39 }
 0x207   :  { %v436_v5 = vmul.f32 %v430_v2, %v317_v3 }
 0x208   :  { %v908_v4 = vpop.eup %907 }
 0x209   :  { %v318_v6 = vmul.f32 %v908_v4, %v304_v40  ;;  %909 = vtanh.f32 %v436_v5 }
 0x20b   :  { %v437_v8 = vmul.f32 %v433_v7, %v318_v6 }
 0x20d   :  { %911 = vtanh.f32 %v437_v8 }
 0x213   :  { %v910_v9 = vpop.eup %909 }
 0x217   :  { %v912_v10 = vpop.eup %911 }
 0x218   :  { %v440_v11 = vpack.c.bf16 %v912_v10, %v910_v9 }
 0x21a   :  { %822 = vmatmul.mubr.bf16.vlgmr.msra.gmra.mrb[4].mxu0 %v440_v11 }
 0x2ed   :  { %v546_v17 = vpop.f32.mrb[4].mxu0 }
 0x2ee   :  { %v547_v18 = vadd.f32 %v718_v16, %v546_v17  ;;  %v823_v19 = vpop.f32.mrb[5].mxu0 }
 0x2ef   :  { %v549_v20 = vpop.f32.mrb[6].mxu0 }
 0x2f0   :  { %v550_v21 = vadd.f32 %v718_v16, %v549_v20  ;;  %v824_v22 = vpop.f32.mrb[7].mxu0  ;;  %913 = vtanh.f32 %v547_v18 }
 0x2f2   :  { %915 = vtanh.f32 %v550_v21 }
 0x2fa   :  { %v914_v23 = vpop.eup %913 }
 0x2fc   :  { %v916_v24 = vpop.eup %915 }
 0x2fd   :  { %v555_v25 = vpack.c.bf16 %v916_v24, %v914_v23 }
 0x2ff   :  { %842 = vmatmul.mubr.bf16.vlgmr.msra.gmra.mrb[4].mxu1 %v555_v25 }
 0x3d2   :  { %v661_v26 = vpop.f32.mrb[4].mxu1 }
 0x3d3   :  { %v662_v27 = vadd.f32 %v727_v0, %v661_v26  ;;  %v843_v28 = vpop.f32.mrb[5].mxu1 }
 0x3d4   :  { %v664_v29 = vpop.f32.mrb[6].mxu1 }
 0x3d5   :  { %668 = vst [vmem:[#allocation13] sm:$0xff] %v662_v27  ;;  %v665_v30 = vadd.f32 %v727_v0, %v664_v29  ;;  %v844_v31 = vpop.f32.mrb[7].mxu1 }
 0x3d7   :  { %669 = vst [vmem:[#allocation13 + $0x8] sm:$0xff] %v665_v30 }
 0x3d8   :  { %1060 = shalt.err (!%p1057_p10)
}
 0x3d9   :  { %s1061_s1 = scalar_lea.hbm %s1306_s10, 256 }
 0x3da   :  { %p1062_p11 = scmp.ne.s32.totalorder %s1306_s10, %s1061_s1  ;;  %p1065_p12 = scmp.lt.u32.totalorder %s1061_s1, %s1306_s10 }
 0x3dc   :  { %p1067_p13 = pnand %p1065_p12, %p1062_p11 }
 0x3de   :  { %1070 = shalt.err (!%p1067_p13)
}
 0x3df   :  { %681 = dma.vmem_to_hbm [thread:$0]  %s676_s15, 256, %s1306_s10, [#allocation4], %s1082_s23, %s1082_s23, %s1083_s24  }
 0x3e0   :  { %1079 = dma.done.wait [#allocation4], 256  }
 0x3e1   :  { %1080 = vsyncadd [#allocation4], 4294967040 }
 0x3e2   :  { %685 = vsyncpa [#allocation3], 1 }
 0x3e3   :  { %686 = vsyncpa [#allocation6], 1 }
 0x3e4   :  { %687 = vsyncpa [#allocation9], 1 }
 0x3e5   :  { %688 = vsyncpa [#allocation12], 1 }
 0x3e6   :  { %689 = vsyncpa [#allocation4], 1 }

</bundles_post_ra>
